<compile_context>
chip_gen: v5e
topology: v5e:2x2
jax: 0.10.0
libtpu: 0.0.40
codegen_flags: <defaults>
</compile_context>

<pallas_src>
import functools

import numpy as np
import jax
import jax.numpy as jnp
from jax import lax
from jax.experimental import pallas as pl
from jax.experimental.pallas import tpu as pltpu


# ---------------------------------------------------------------------------
# Parameter (buffer) construction -- deterministic, mirrors the PyTorch init.
# ---------------------------------------------------------------------------
def make_positional_encoding_table(max_len: int, d_model: int,
                                   dtype=jnp.float32) -> jax.Array:
    """Returns pe of shape (max_len, 1, d_model), like the PyTorch buffer."""
    assert d_model % 2 == 0, "d_model must be even (as in the PyTorch module)"
    position = jnp.arange(max_len, dtype=jnp.float32)[:, None]             # (L, 1)
    div_term = jnp.exp(jnp.arange(0, d_model, 2, dtype=jnp.float32)
                       * (-np.log(10000.0) / d_model))                     # (D/2,)
    angles = position * div_term                                           # (L, D/2)
    pe = jnp.zeros((max_len, d_model), jnp.float32)
    pe = pe.at[:, 0::2].set(jnp.sin(angles))
    pe = pe.at[:, 1::2].set(jnp.cos(angles))
    return pe[:, None, :].astype(dtype)                                    # (L, 1, D)


# ---------------------------------------------------------------------------
# Tile sizing: ~4 MiB of x per step, capped so the sublane-padded (seq_tile,1,D)
# pe stream and the (seq_tile,1,1) row-index stream stay small even when B*D is
# tiny.  2 x double-buffered x/out tiles + pe tiles stay far under 48 MiB VMEM.
# ---------------------------------------------------------------------------
_TARGET_TILE_BYTES = 4 * 1024 * 1024
_MAX_SEQ_TILE = 512


def _choose_seq_tile(seq_len: int, row_bytes: int, target_bytes: int) -> int:
    """Largest multiple-of-8 divisor of seq_len whose x tile fits the target."""
    if seq_len % 8 != 0:
        return seq_len                      # single whole-array tile fallback
    best = 8
    for cand in range(8, seq_len + 1, 8):
        if (seq_len % cand == 0 and cand <= _MAX_SEQ_TILE
                and cand * row_bytes <= target_bytes):
            best = cand
    return best


# ---------------------------------------------------------------------------
# Pallas kernel: out = dropout(x + pe) on (seq_tile, B, D) tiles.
# ---------------------------------------------------------------------------
def _pos_enc_kernel(seed_ref, x_ref, pe_ref, rows_ref, o_ref, *, p_drop: float,
                    training: bool):
    # x_ref/o_ref : (ts, B, D)   pe_ref : (ts, 1, D)   rows_ref : (ts, 1, 1) i32
    # seed_ref    : (1,) int32 in SMEM (scalar prefetch)
    y = x_ref[...] + pe_ref[...]            # broadcast add over batch (sublane)

    if (not training) or p_drop <= 0.0:     # eval mode: dropout = identity
        o_ref[...] = y.astype(o_ref.dtype)
        return

    if p_drop >= 1.0:                       # degenerate: drop everything
        o_ref[...] = jnp.zeros(o_ref.shape, o_ref.dtype)
        return

    # Counter-based hash PRNG (lowbias32): mask depends only on the GLOBAL
    # element index and the user seed -> identical regardless of tiling, safe
    # under "parallel" grid sharding, zero PRNG state, pure VPU int ops.
    # TODO(synk): does not reproduce torch's nn.Dropout RNG stream (only the
    # Bernoulli(1-p) + 1/(1-p) scaling semantics).
    ts, B, D = y.shape
    b_io = lax.broadcasted_iota(jnp.int32, (B, D), 0)
    d_io = lax.broadcasted_iota(jnp.int32, (B, D), 1)
    bd = (b_io * D + d_io)[None, :, :]                        # (1, B, D)
    idx = rows_ref[...] * (B * D) + bd                        # (ts, B, D) global id

    seed_u = seed_ref[0].astype(jnp.uint32) * jnp.uint32(0x9E3779B9)
    z = idx.astype(jnp.uint32) ^ seed_u
    z = (z ^ (z >> 16)) * jnp.uint32(0x7FEB352D)
    z = (z ^ (z >> 15)) * jnp.uint32(0x846CA68B)
    z = z ^ (z >> 16)
    u = (z >> 9).astype(jnp.int32)                            # uniform [0, 2^23)
    thresh = jnp.int32(int(round(p_drop * float(1 << 23))))
    keep = u >= thresh                                        # P(keep) = 1 - p

    scale = jnp.asarray(1.0 / (1.0 - p_drop), dtype=y.dtype)
    o_ref[...] = jnp.where(keep, y * scale, jnp.zeros_like(y)).astype(o_ref.dtype)


# ---------------------------------------------------------------------------
# Wrapper: natural (S, B, D) layout, grid over the sequence axis.
# ---------------------------------------------------------------------------
def positional_encoding_forward(x: jax.Array, pe: jax.Array, *,
                                p_drop: float = 0.05,
                                training: bool = True,
                                seed: int = 0,
                                seq_tile: int | None = None) -> jax.Array:
    """x: (seq_len, batch, d_model); pe: (max_len, 1, d_model)."""
    S, B, D = x.shape
    assert pe.ndim == 3 and pe.shape[1] == 1 and pe.shape[2] == D and pe.shape[0] >= S
    if pe.dtype != x.dtype:
        pe = pe.astype(x.dtype)

    if seq_tile is None:
        seq_tile = _choose_seq_tile(S, B * D * x.dtype.itemsize, _TARGET_TILE_BYTES)
    if S % seq_tile != 0:
        raise ValueError(f"seq_tile={seq_tile} must divide seq_len={S}")
    grid = (S // seq_tile,)

    rows = jnp.arange(S, dtype=jnp.int32).reshape(S, 1, 1)   # global seq indices
    seed_arr = jnp.asarray([seed], dtype=jnp.int32)
    kernel = functools.partial(_pos_enc_kernel, p_drop=float(p_drop),
                               training=bool(training))

    return pl.pallas_call(
        kernel,
        out_shape=jax.ShapeDtypeStruct((S, B, D), x.dtype),
        grid_spec=pltpu.PrefetchScalarGridSpec(
            num_scalar_prefetch=1,                       # seed -> SMEM
            grid=grid,
            in_specs=[
                pl.BlockSpec((seq_tile, B, D), lambda i, seed_ref: (i, 0, 0)),  # x
                pl.BlockSpec((seq_tile, 1, D), lambda i, seed_ref: (i, 0, 0)),  # pe
                pl.BlockSpec((seq_tile, 1, 1), lambda i, seed_ref: (i, 0, 0)),  # rows
            ],
            out_specs=pl.BlockSpec((seq_tile, B, D), lambda i, seed_ref: (i, 0, 0)),
        ),
        compiler_params=pltpu.CompilerParams(
            dimension_semantics=("parallel",),           # independent seq tiles
            vmem_limit_bytes=48 * 1024 * 1024,           # headroom under v7x 64 MiB
        ),
    )(seed_arr, x, pe, rows)


# ---------------------------------------------------------------------------
# Demo / smoke test
# ---------------------------------------------------------------------------
if __name__ == "__main__":
    SEQ, BATCH, D_MODEL = 32, 2, 128
    MAX_LEN = 5000
    P_DROP = 0.05

    key = jax.random.PRNGKey(0)
    x = jax.random.normal(key, (SEQ, BATCH, D_MODEL), dtype=jnp.float32)
    pe = make_positional_encoding_table(MAX_LEN, D_MODEL)     # (5000, 1, 128)
    ref = x + pe[:SEQ]                                        # broadcast over batch

    # Eval mode (dropout = identity): exact check vs. pure-JAX reference,
    # exercising a multi-step grid (seq_tile=8 -> 4 tiles).
    out_eval = positional_encoding_forward(x, pe, p_drop=P_DROP,
                                           training=False, seq_tile=8)
    jax.block_until_ready(out_eval)
    assert out_eval.shape == (SEQ, BATCH, D_MODEL)
    assert jnp.allclose(out_eval, ref, atol=1e-6), "eval-mode mismatch"

    # Training mode: kept values must equal ref/(1-p); drop rate must be sane.
    out_train = positional_encoding_forward(x, pe, p_drop=P_DROP,
                                            training=True, seed=0, seq_tile=8)
    jax.block_until_ready(out_train)
    assert out_train.shape == (SEQ, BATCH, D_MODEL)
    kept = out_train != 0
    scale = 1.0 / (1.0 - P_DROP)
    assert jnp.allclose(out_train, jnp.where(kept, ref * scale, 0.0),
                        atol=1e-5), "train-mode kept values mismatch"
    drop_frac = 1.0 - float(jnp.mean(kept.astype(jnp.float32)))
    assert 0.0 < drop_frac < 0.5, f"implausible drop fraction {drop_frac}"

    # Dropout mask depends only on (seed, global element index) => identical
    # result regardless of the tiling chosen.
    out_train_1tile = positional_encoding_forward(x, pe, p_drop=P_DROP,
                                                  training=True, seed=0,
                                                  seq_tile=32)
    jax.block_until_ready(out_train_1tile)
    assert jnp.allclose(out_train, out_train_1tile), "dropout not tiling-invariant"

    print("KERNEL_OK")
</pallas_src>

<mosaic_0001>
module attributes {stable_mosaic.version = 11 : i64} {
  func.func @_pos_enc_kernel(%arg0: i32, %arg1: memref<1xi32, #tpu.memory_space<smem>>, %arg2: memref<8x2x128xf32, #tpu.memory_space<vmem>>, %arg3: memref<8x1x128xf32, #tpu.memory_space<vmem>>, %arg4: memref<8x1x1xi32, #tpu.memory_space<vmem>>, %arg5: memref<8x2x128xf32, #tpu.memory_space<vmem>>) attributes {dimension_semantics = [#tpu.dimension_semantics<parallel>], iteration_bounds = array<i64: 4>, scalar_prefetch = 1 : i64, scratch_operands = 0 : i64, tpu.core_type = #tpu.core_type<tc>, window_params = [{transform_indices = @transform_0, window_bounds = array<i64: 8, 2, 128>}, {transform_indices = @transform_1, window_bounds = array<i64: 8, 1, 128>}, {transform_indices = @transform_2, window_bounds = array<i64: 8, 1, 1>}, {transform_indices = @transform_3, window_bounds = array<i64: 8, 2, 128>}]} {
    %c0 = arith.constant 0 : index
    %c0_0 = arith.constant 0 : index
    %c0_1 = arith.constant 0 : index
    %0 = vector.load %arg2[%c0, %c0_0, %c0_1] : memref<8x2x128xf32, #tpu.memory_space<vmem>>, vector<8x2x128xf32>
    %c0_2 = arith.constant 0 : index
    %c0_3 = arith.constant 0 : index
    %c0_4 = arith.constant 0 : index
    %1 = vector.load %arg3[%c0_2, %c0_3, %c0_4] : memref<8x1x128xf32, #tpu.memory_space<vmem>>, vector<8x1x128xf32>
    %2 = vector.broadcast %1 : vector<8x1x128xf32> to vector<8x2x128xf32>
    %3 = arith.addf %0, %2 : vector<8x2x128xf32>
    %c0_5 = arith.constant 0 : index
    %c0_6 = arith.constant 0 : index
    %c0_7 = arith.constant 0 : index
    %4 = vector.load %arg5[%c0_5, %c0_6, %c0_7] : memref<8x2x128xf32, #tpu.memory_space<vmem>>, vector<8x2x128xf32>
    tpu.vector_store %arg5[%c0_5, %c0_6, %c0_7], %3 {strides = array<i32>} : memref<8x2x128xf32, #tpu.memory_space<vmem>>, vector<8x2x128xf32>,
    return
  }
  func.func @transform_0(%arg0: i32, %arg1: memref<1xi32, #tpu.memory_space<smem>>) -> (i32, i32, i32) {
    %c0_i32 = arith.constant 0 : i32
    %c0_i32_0 = arith.constant 0 : i32
    %c0_i32_1 = arith.constant 0 : i32
    return %arg0, %c0_i32, %c0_i32_0 : i32, i32, i32
  }
  func.func @transform_1(%arg0: i32, %arg1: memref<1xi32, #tpu.memory_space<smem>>) -> (i32, i32, i32) {
    %c0_i32 = arith.constant 0 : i32
    %c0_i32_0 = arith.constant 0 : i32
    %c0_i32_1 = arith.constant 0 : i32
    return %arg0, %c0_i32, %c0_i32_0 : i32, i32, i32
  }
  func.func @transform_2(%arg0: i32, %arg1: memref<1xi32, #tpu.memory_space<smem>>) -> (i32, i32, i32) {
    %c0_i32 = arith.constant 0 : i32
    %c0_i32_0 = arith.constant 0 : i32
    %c0_i32_1 = arith.constant 0 : i32
    return %arg0, %c0_i32, %c0_i32_0 : i32, i32, i32
  }
  func.func @transform_3(%arg0: i32, %arg1: memref<1xi32, #tpu.memory_space<smem>>) -> (i32, i32, i32) {
    %c0_i32 = arith.constant 0 : i32
    %c0_i32_0 = arith.constant 0 : i32
    %c0_i32_1 = arith.constant 0 : i32
    return %arg0, %c0_i32, %c0_i32_0 : i32, i32, i32
  }
}

</mosaic_0001>

<bundles_post_ra>
// kernel: tpu_custom_call.1
= control target key start
LH: loop header
LB: loop body
LE: loop exit
PB: predicated region body
PF: predicated region fallthrough
CT: control target
= control target key end

     0   :  { %10 = vsyncpa [#allocation5], 0  ;;  %s877_s0 = inlined_call_operand.<no memory space> [shape: s32[1], index: 0, kind: input, shape index: {}]   ;;  %s878_s1 = inlined_call_operand.hbm [shape: f32[32,2,128], index: 1, kind: input, shape index: {}]   ;;  %s879_s2 = inlined_call_operand.hbm [shape: f32[5000,1,128], index: 2, kind: input, shape index: {}]   ;;  %s880_s3 = inlined_call_operand.vmem [shape: s32[32,1,1], index: 3, kind: input, shape index: {}]   ;;  %s881_s4 = inlined_call_operand.hbm [shape: f32[32,2,128], index: 4, kind: output, shape index: {}]  }
   0x1   :  { %12 = vsyncpa [#allocation5 + $0x1], 0 }
   0x2   :  { %13 = vsyncpa [#allocation8], 0 }
   0x3   :  { %15 = vsyncpa [#allocation8 + $0x1], 0 }
   0x4   :  { %16 = vsyncpa [#allocation6], 0 }
   0x5   :  { %18 = vsyncpa [#allocation6 + $0x1], 0  ;;  %s680_s15 = smov 0   ;;  %s682_s0 = smov 0  }
   0x6   :  { %s684_s16 = smov 0   ;;  %s686_s17 = smov 0  }
   0x7 LB: > { %s701_s3 = sadd.s32 4294967295, %s647_s17   ;;  %s433_s18 = sadd.s32 4294967294, %s647_s17   ;;  %s647_s17 = sphi %s686_s17, %s891_s17   ;;  %s643_s16 = sphi %s684_s16, %s890_s16   ;;  %s639_s0 = sphi %s682_s0, %s889_s0   ;;  %s635_s15 = sphi %s680_s15, %s888_s15  }
   0x8   : > { %s705_s19 = sadd.s32 1, %s647_s17   ;;  %s31_s20 = sadd.s32 1, %s643_s16 }
   0x9   : > { %s28_s21 = ssub.s32 %s647_s17, %s705_s19  ;;  %p38_p0 = scmp.ne.s32.totalorder %s643_s16, %s639_s0 }
   0xa   : > { %p29_p1 = scmp.eq.s32.totalorder %s28_s21, 0  ;;  %p39_p2 = scmp.eq.s32.totalorder %s647_s17, 0 }
   0xb   : > { %p44_p3 = scmp.ne.s32.totalorder %s639_s0, %s635_s15  ;;  %p45_p4 = scmp.eq.s32.totalorder %s701_s3, 0 }
   0xc   : > { %s717_s22 = scalar_select %p29_p1, %s643_s16, %s31_s20  }
   0xd   : > { %p719_p5 = por %p39_p2, %p38_p0  ;;  %p723_p6 = por %p45_p4, %p44_p3 }
   0xe   : > { %p120_p7 = scmp.eq.s32.totalorder %s701_s3, 3  ;;  %p126_p8 = scmp.eq.s32.totalorder %s433_s18, 3 }
   0xf   : > { %p469_p9 = scmp.lt.s32.totalorder %s647_s17, 4  ;;  %s738_s27 = sand.u32 1, %s643_s16  }
  0x10   : > { %p729_p10 = por %p120_p7, %p38_p0  ;;  %p733_p11 = por %p126_p8, %p44_p3 }
  0x11   : > { %s450_s28 = sshll.u32 %s647_s17, 4  ;;  %s436_s29 = sshll.u32 %s738_s27, 4 }
  0x12   : > { %s155_s6 = scalar_lea.hbm %s878_s1, %s450_s28  ;;  %s150_s8 = scalar_lea.vmem [#allocation4], %s436_s29 }
  0x13   : > { %s156_s7 = sshll.u32 %s155_s6, 4  ;;  %s158_s9 = sshll.u32 %s150_s8, 4  ;;  %s157_s7 = int_to_ptr.hbm [resolvable:$true] %s156_s7  ;;  %s159_s9 = int_to_ptr.vmem [resolvable:$true] %s158_s9 }
  0x14   : > { %p747_p12 = pnand %p469_p9, %p719_p5  ;;  %p441_p13 = scmp.ge.s32.totalorder %s647_s17, 1 }
  0x15   : > { %p195_p0 = scmp.lt.s32.totalorder %s647_s17, 5  ;;  %s147_s11 = scalar_lea.sflag [#allocation5], %s738_s27 }
  0x16   : > { %s517_s12 = sshra.s32 %s157_s7, 4  ;;  %p521_p2 = pneg %p747_p12  ;;  %s518_s12 = int_to_ptr.hbm [resolvable:$true] %s517_s12 }
  0x17   : > { %s519_s13 = scalar_lea.hbm %s518_s12, 16  ;;  %s524_s20 = scalar_lea.hbm %s878_s1, 64 }
  0x18   : > { %p520_p1 = scmp.ne.s32.totalorder %s518_s12, %s519_s13  ;;  %p525_p5 = scmp.lt.s32.totalorder %s518_s12, %s878_s1 }
  0x19   : > { %p526_p7 = scmp.lt.s32.totalorder %s524_s20, %s519_s13 }
  0x1a   : > { %p522_p3 = pnand %p521_p2, %p520_p1 }
  0x1b   : > { %p527_p8 = por %p526_p7, %p525_p5 }
  0x1c   : > { %p523_p4 = pneg %p522_p3 }
  0x1e   : > { %p528_p9 = pnand %p527_p8, %p523_p4 }
  0x20   : > { %531 = shalt.err (!%p528_p9)
}
  0x21   : > { %s649_s28 = smov 32   ;;  %s650_s29 = smov 2  }
  0x22   : > { %461 = dma.hbm_to_vmem [thread:$0]  (!%p747_p12), %s157_s7, 256, %s159_s9, %s147_s11, %s649_s28, %s649_s28, %s650_s29  }
  0x23   : > { %p771_p1 = pnand %p441_p13, %p195_p0  ;;  %s439_s5 = sshll.u32 %s738_s27, 3 }
  0x24   : > { %s440_s6 = sshll.u32 %s647_s17, 3  ;;  %s172_s18 = scalar_lea.vmem [#allocation7], %s439_s5 }
  0x25   : > { %s176_s13 = scalar_lea.hbm %s879_s2, %s440_s6  ;;  %s179_s20 = sshll.u32 %s172_s18, 4  ;;  %s180_s20 = int_to_ptr.vmem [resolvable:$true] %s179_s20 }
  0x26   : > { %s177_s14 = sshll.u32 %s176_s13, 4  ;;  %s169_s21 = scalar_lea.sflag [#allocation8], %s738_s27  ;;  %s178_s14 = int_to_ptr.hbm [resolvable:$true] %s177_s14 }
  0x27   : > { %s547_s23 = sshra.s32 %s178_s14, 4  ;;  %s554_s28 = scalar_lea.hbm %s879_s2, 5000  ;;  %s548_s23 = int_to_ptr.hbm [resolvable:$true] %s547_s23 }
  0x28   : > { %s549_s7 = scalar_lea.hbm %s548_s23, 8  ;;  %p555_p4 = scmp.lt.s32.totalorder %s548_s23, %s879_s2 }
  0x29   : > { %p550_p3 = scmp.ne.s32.totalorder %s548_s23, %s549_s7  ;;  %p556_p5 = scmp.lt.s32.totalorder %s554_s28, %s549_s7 }
  0x2b   : > { %p552_p13 = pnand %p550_p3, %p521_p2  ;;  %p557_p7 = por %p556_p5, %p555_p4 }
  0x2d   : > { %p553_p0 = pneg %p552_p13 }
  0x2f   : > { %p558_p8 = pnand %p557_p7, %p553_p0 }
  0x31   : > { %561 = shalt.err (!%p558_p8)
}
  0x32   : > { %s651_s27 = smov 16   ;;  %s652_s5 = smov 1  }
  0x33   : > { %464 = dma.hbm_to_vmem [thread:$0]  (!%p747_p12), %s178_s14, 128, %s180_s20, %s169_s21, %s651_s27, %s651_s27, %s652_s5  }
  0x34   : > { %199 = sbr.rel (%p771_p1) target bundleno = 81 (0x51), region = 32  ;;  %s795_s8 = sand.u32 (!%p771_p1), 1, %s639_s0  }
  0x35   : > { %s442_s12 = sshll.u32 (!%p771_p1), %s795_s8, 4  ;;  %s202_s13 = scalar_lea.sflag (!%p771_p1), [#allocation5], %s795_s8 }
  0x36   : > { %s799_s18 = scalar_lea.vmem (!%p771_p1), [#allocation4], %s442_s12 }
  0x39   : > { %622 = dma.done.wait (%p723_p6), %s202_s13, 256  }
  0x3a   : > { %624 = vsyncadd (%p723_p6), %s202_s13, 4294967040  ;;  %s443_s10 = sshll.u32 %s795_s8, 3  ;;  %s212_s30 = scalar_lea.sflag [#allocation8], %s795_s8 }
  0x3b   : > { %s807_s14 = scalar_lea.vmem [#allocation7], %s443_s10 }
  0x3c   : > { %626 = dma.done.wait (%p723_p6), %s212_s30, 128  }
  0x3d   : > { %628 = vsyncadd (%p723_p6), %s212_s30, 4294967168  ;;  %s451_s20 = sshll.u32 %s701_s3, 4  ;;  %s814_s21 = scalar_lea.vmem [#allocation9], %s442_s12  ;;  %v256_v0 = vld [vmem:[%s799_s18] sm:$0x3] }
  0x3e   : > { %s325_s23 = sshll.u32 %s814_s21, 4  ;;  %v509_v1 = vld [vmem:[%s807_s14] ss:$0 sm:$0xff]  ;;  %v257_v2 = vld [vmem:[%s799_s18 + $0x2] sm:$0x3]  ;;  %s824_s9 = scalar_lea.hbm %s881_s4, %s451_s20  ;;  %s326_s23 = int_to_ptr.vmem [resolvable:$true] %s325_s23 }
  0x3f   : > { %v510_v3 = vld [vmem:[%s807_s14 + $0x1] ss:$0 sm:$0xff]  ;;  %v296_v4 = vadd.f32 %v509_v1, %v256_v0  ;;  %v258_v5 = vld [vmem:[%s799_s18 + $0x4] sm:$0x3]  ;;  %v511_v6 = vld [vmem:[%s807_s14 + $0x2] ss:$0 sm:$0xff] }
  0x40   : > { %v297_v7 = vadd.f32 %v510_v3, %v257_v2  ;;  %v259_v8 = vld [vmem:[%s799_s18 + $0x6] sm:$0x3]  ;;  %v512_v9 = vld [vmem:[%s807_s14 + $0x3] ss:$0 sm:$0xff]  ;;  %v298_v10 = vadd.f32 %v511_v6, %v258_v5  ;;  %v260_v11 = vld [vmem:[%s799_s18 + $0x8] sm:$0x3] }
  0x41   : > { %304 = vst [vmem:[%s814_s21] sm:$0x3] %v296_v4  ;;  %s327_s3 = sshll.u32 %s824_s9, 4  ;;  %v299_v12 = vadd.f32 %v512_v9, %v259_v8  ;;  %v513_v13 = vld [vmem:[%s807_s14 + $0x4] ss:$0 sm:$0xff]  ;;  %v261_v14 = vld [vmem:[%s799_s18 + $0xa] sm:$0x3]  ;;  %s328_s3 = int_to_ptr.hbm [resolvable:$true] %s327_s3 }
  0x42   : > { %305 = vst [vmem:[%s814_s21 + $0x2] sm:$0x3] %v297_v7  ;;  %v514_v15 = vld [vmem:[%s807_s14 + $0x5] ss:$0 sm:$0xff]  ;;  %v300_v16 = vadd.f32 %v513_v13, %v260_v11  ;;  %v262_v17 = vld [vmem:[%s799_s18 + $0xc] sm:$0x3] }
  0x43   : > { %306 = vst [vmem:[%s814_s21 + $0x4] sm:$0x3] %v298_v10  ;;  %v301_v18 = vadd.f32 %v514_v15, %v261_v14  ;;  %v515_v19 = vld [vmem:[%s807_s14 + $0x6] ss:$0 sm:$0xff]  ;;  %v263_v20 = vld [vmem:[%s799_s18 + $0xe] sm:$0x3] }
  0x44   : > { %307 = vst [vmem:[%s814_s21 + $0x6] sm:$0x3] %v299_v12  ;;  %v516_v21 = vld [vmem:[%s807_s14 + $0x7] ss:$0 sm:$0xff]  ;;  %v302_v22 = vadd.f32 %v515_v19, %v262_v17  ;;  %s313_s11 = scalar_lea.sflag [#allocation6], %s795_s8  ;;  %s591_s28 = sshra.s32 %s328_s3, 4  ;;  %s592_s28 = int_to_ptr.hbm [resolvable:$true] %s591_s28 }
  0x45   : > { %308 = vst [vmem:[%s814_s21 + $0x8] sm:$0x3] %v300_v16  ;;  %v303_v23 = vadd.f32 %v516_v21, %v263_v20  ;;  %s593_s29 = scalar_lea.hbm %s592_s28, 16  ;;  %s597_s5 = scalar_lea.hbm %s881_s4, 64 }
  0x46   : > { %309 = vst [vmem:[%s814_s21 + $0xa] sm:$0x3] %v301_v18  ;;  %p594_p6 = scmp.ne.s32.totalorder %s592_s28, %s593_s29  ;;  %p598_p9 = scmp.lt.s32.totalorder %s592_s28, %s881_s4 }
  0x47   : > { %310 = vst [vmem:[%s814_s21 + $0xc] sm:$0x3] %v302_v22  ;;  %p599_p1 = scmp.lt.s32.totalorder %s597_s5, %s593_s29 }
  0x48   : > { %311 = vst [vmem:[%s814_s21 + $0xe] sm:$0x3] %v303_v23  ;;  %p595_p12 = pnand %p594_p6, %p729_p10 }
  0x49   : > { %p600_p3 = por %p599_p1, %p598_p9 }
  0x4a   : > { %p596_p2 = pneg %p595_p12 }
  0x4c   : > { %p601_p13 = pnand %p600_p3, %p596_p2 }
  0x4e   : > { %604 = shalt.err (!%p601_p13)
}
  0x4f   : > { %s653_s8 = smov 32   ;;  %s654_s18 = smov 2  }
  0x50   : > { %456 = dma.vmem_to_hbm [thread:$0]  (%p729_p10), %s326_s23, 256, %s328_s3, %s313_s11, %s653_s8, %s653_s8, %s654_s18  }
  0x51 PF: > { %p470_p0 = scmp.ge.s32.totalorder %s647_s17, 2  ;;  %s342_s10 = sand.u32 1, %s635_s15  }
  0x52   : > { %s343_s30 = scalar_lea.sflag [#allocation6], %s342_s10 }
  0x53   : > { %p466_p4 = pnand %p470_p0, %p733_p11 }
  0x55   : > { %p467_p5 = pneg %p466_p4 }
  0x57   : > { %630 = dma.done.wait (%p467_p5), %s343_s30, 256  }
  0x58   : > { %632 = vsyncadd (%p467_p5), %s343_s30, 4294967040  ;;  %p21_p7 = scmp.ge.s32.totalorder %s705_s19, 6   ;;  %s888_s15 = smov %s639_s0 }
  0x59   : > { %s889_s0 = smov %s643_s16  ;;  %s890_s16 = smov %s717_s22 }
  0x5a   : > { %s891_s17 = smov %s705_s19  ;;  %23 = sbr.rel (!%p21_p7) target bundleno = 7 (0x7), region = 93 }
  0x5f   :  { %349 = vsyncpa [#allocation5], 1 }
  0x60   :  { %351 = vsyncpa [#allocation5 + $0x1], 1 }
  0x61   :  { %352 = vsyncpa [#allocation8], 1 }
  0x62   :  { %354 = vsyncpa [#allocation8 + $0x1], 1 }
  0x63   :  { %355 = vsyncpa [#allocation6], 1 }
  0x64   :  { %357 = vsyncpa [#allocation6 + $0x1], 1 }

</bundles_post_ra>
